<compile_context>
chip_gen: v7x
topology: tpu7x:2x2x1
jax: 0.10.0
libtpu: 0.0.40
codegen_flags: <defaults>
</compile_context>

<pallas_src>
import functools
import math

import jax
import jax.numpy as jnp
from jax.experimental import pallas as pl
from jax.experimental.pallas import tpu as pltpu


_SQRT_2_OVER_PI = 0.7978845608028654


def _gelu_tanh(h):
    # tanh-approximation GELU (matches the common free `gelu` helper used with
    # this module).  TODO(synk): swap to exact erf GELU if the module's gelu uses erf.
    return 0.5 * h * (1.0 + jnp.tanh(_SQRT_2_OVER_PI * (h + 0.044715 * h * h * h)))


# ----------------------------------------------------------------------------
# Fused feed-forward kernel
# grid = (M tiles ["parallel"], hidden tiles ["arbitrary" = reduction of matmul #2])
# ----------------------------------------------------------------------------
def _ffn_kernel(x_ref, w1_ref, b1_ref, w2_ref, b2_ref, o_ref, acc_ref, *, activation):
    @pl.when(pl.program_id(1) == 0)
    def _init():
        acc_ref[...] = jnp.zeros_like(acc_ref)

    # matmul #1 (bf16 MXU, f32 acc) + f32 bias + activation, all fused in VMEM/vregs
    h = jnp.dot(x_ref[...], w1_ref[...], preferred_element_type=jnp.float32)
    h = h + b1_ref[...]
    if activation == "relu":
        h = jnp.maximum(h, 0.0)
    else:  # gelu
        h = _gelu_tanh(h)

    # matmul #2: accumulate partial products over hidden slabs into f32 VMEM acc
    acc_ref[...] += jnp.dot(
        h.astype(jnp.bfloat16), w2_ref[...], preferred_element_type=jnp.float32
    )

    @pl.when(pl.program_id(1) == pl.num_programs(1) - 1)
    def _finalize():
        o_ref[...] = (acc_ref[...] + b2_ref[...]).astype(o_ref.dtype)


# ----------------------------------------------------------------------------
# Tiling helpers
# ----------------------------------------------------------------------------
def _round_up(x, m):
    return ((x + m - 1) // m) * m


def _round_down(x, m):
    return (x // m) * m


def _cdiv(a, b):
    return (a + b - 1) // b


def _vmem_budget():
    try:
        cap = int(pltpu.get_tpu_info().vmem_capacity_bytes)
    except Exception:
        cap = 64 * 1024 * 1024  # conservative fallback (v7x per-TC VMEM)
    limit = min(int(0.85 * cap), 100 * 1024 * 1024)
    budget = max(16 * 1024 * 1024, limit - 6 * 1024 * 1024)  # headroom for compiler scratch
    return limit, budget


def _largest_mult128_divisor(n, cap):
    """Largest divisor of n that is a multiple of 128 and <= cap (n % 128 == 0)."""
    best = 128
    d = 128
    while d <= min(n, cap):
        if n % d == 0:
            best = d
        d += 128
    return best


# ----------------------------------------------------------------------------
# Wrapper
# ----------------------------------------------------------------------------
def transformer_feed_forward(x, params, *, activation="relu", tm=512, th_cap=None):
    """Fused FFN: w2 @ act(w1 @ x + b1) + b2.  Dropout is eval-mode identity."""
    w1 = params["w1"].astype(jnp.bfloat16)
    w2 = params["w2"].astype(jnp.bfloat16)
    b1 = params["b1"].astype(jnp.float32)
    b2 = params["b2"].astype(jnp.float32)

    C = x.shape[-1]
    H = w1.shape[1]
    lead = x.shape[:-1]
    out_dtype = x.dtype

    x2 = x.reshape(-1, C).astype(jnp.bfloat16)
    M = x2.shape[0]

    vmem_limit, budget = _vmem_budget()

    # ---- row (M) tiling: minimize padding, keep >= 2 tiles so both v7x TCs get work
    per_row_bytes = C * (2 * 2 + 2 * 4 + 4)  # x dbuf (bf16) + out dbuf (f32) + acc (f32)
    tm_cap = max(16, _round_down((budget // 2) // per_row_bytes, 16))
    tm_target = max(16, min(tm, tm_cap))
    num_m = _cdiv(M, tm_target)
    if num_m == 1 and M >= 16:
        num_m = 2
    tm_eff = _round_up(_cdiv(M, num_m), 16)  # 16-aligned (bf16 sublane packing)
    M_pad = num_m * tm_eff
    if M_pad != M:
        x2 = jnp.pad(x2, ((0, M_pad - M), (0, 0)))

    # ---- hidden (H) tiling: keep full W1/W2 resident when they fit the VMEM budget,
    # otherwise tile the reduction with 128-aligned slabs (zero-pad H if needed).
    fixed = tm_eff * per_row_bytes + 2 * C * 4                 # row-tile buffers + b2
    per_th = 8 * C + 2 * 4 + tm_eff * 6                        # W1+W2 dbuf (bf16) + b1 + h
    th_budget = max(128, (budget - fixed) // per_th)
    if th_cap is not None:
        th_budget = min(th_budget, max(128, th_cap))
    if H <= th_budget:
        H_pad, th_eff = H, H                                    # fully resident weights
    else:
        H_pad = _round_up(H, 128)
        th_eff = _largest_mult128_divisor(H_pad, th_budget)
    num_h = H_pad // th_eff
    if H_pad != H:  # padded hidden units: w1 cols = 0, b1 = 0, w2 rows = 0 -> contribute 0
        w1 = jnp.pad(w1, ((0, 0), (0, H_pad - H)))
        b1 = jnp.pad(b1, ((0, H_pad - H),))
        w2 = jnp.pad(w2, ((0, H_pad - H), (0, 0)))

    grid = (num_m, num_h)

    # Weights are DMA'd once if resident (num_h == 1), else re-streamed per row tile.
    w_stream = (1 if num_h == 1 else num_m) * 2 * C * H_pad * 2
    cost = pl.CostEstimate(
        flops=int(4 * M_pad * C * H_pad),
        transcendentals=int(M_pad * H_pad if activation != "relu" else 0),
        bytes_accessed=int(M_pad * C * 2 + M_pad * C * 4 + w_stream),
    )

    out = pl.pallas_call(
        functools.partial(_ffn_kernel, activation=activation),
        out_shape=jax.ShapeDtypeStruct((M_pad, C), out_dtype),
        grid=grid,
        in_specs=[
            pl.BlockSpec((tm_eff, C), lambda i, h: (i, 0)),   # x row tile (const over h)
            pl.BlockSpec((C, th_eff), lambda i, h: (0, h)),   # W1 hidden slab (bf16)
            pl.BlockSpec((1, th_eff), lambda i, h: (0, h)),   # b1 hidden slab (f32)
            pl.BlockSpec((th_eff, C), lambda i, h: (h, 0)),   # W2 hidden slab (bf16)
            pl.BlockSpec((1, C), lambda i, h: (0, 0)),        # b2 (f32)
        ],
        out_specs=pl.BlockSpec((tm_eff, C), lambda i, h: (i, 0)),
        scratch_shapes=[pltpu.VMEM((tm_eff, C), jnp.float32)],
        compiler_params=pltpu.CompilerParams(
            dimension_semantics=("parallel", "arbitrary"),
            vmem_limit_bytes=vmem_limit,
        ),
        cost_estimate=cost,
    )(x2, w1, b1.reshape(1, H_pad), w2, b2.reshape(1, C))

    return out[:M].reshape(*lead, C)


# ----------------------------------------------------------------------------
# Parameter init (PyTorch nn.Linear-style U(-1/sqrt(fan_in), 1/sqrt(fan_in)),
# weights stored pre-transposed in (in, out) layout AND in bf16 for the MXU).
# ----------------------------------------------------------------------------
def init_params(key, size, hidden_size):
    k1, k2, k3, k4 = jax.random.split(key, 4)
    bnd1 = 1.0 / math.sqrt(size)
    bnd2 = 1.0 / math.sqrt(hidden_size)
    w1 = jax.random.uniform(k1, (size, hidden_size), jnp.float32, -bnd1, bnd1)
    b1 = jax.random.uniform(k2, (hidden_size,), jnp.float32, -bnd1, bnd1)
    w2 = jax.random.uniform(k3, (hidden_size, size), jnp.float32, -bnd2, bnd2)
    b2 = jax.random.uniform(k4, (size,), jnp.float32, -bnd2, bnd2)
    return dict(
        w1=w1.astype(jnp.bfloat16),
        b1=b1,
        w2=w2.astype(jnp.bfloat16),
        b2=b2,
    )


# ----------------------------------------------------------------------------
# Plain-JAX reference that mirrors the kernel's numerics (bf16 MXU, f32 acc/bias)
# ----------------------------------------------------------------------------
def reference_ffn(x, params, activation="relu"):
    w1 = params["w1"].astype(jnp.bfloat16)
    w2 = params["w2"].astype(jnp.bfloat16)
    h = jnp.dot(x.astype(jnp.bfloat16), w1, preferred_element_type=jnp.float32)
    h = h + params["b1"].astype(jnp.float32)
    h = jnp.maximum(h, 0.0) if activation == "relu" else _gelu_tanh(h)
    y = jnp.dot(h.astype(jnp.bfloat16), w2, preferred_element_type=jnp.float32)
    return (y + params["b2"].astype(jnp.float32)).astype(x.dtype)


if __name__ == "__main__":
    key = jax.random.PRNGKey(0)
    k0, k1, k2, k3, k4, k5 = jax.random.split(key, 6)

    # --- case 1: small shapes consistent with the module (B=2, T=8, size=32, hidden=64)
    #     -> weights fully resident, grid (2, 1)
    B, T, C, Hsz = 2, 8, 32, 64
    params = init_params(k0, size=C, hidden_size=Hsz)
    x = jax.random.normal(k1, (B, T, C), jnp.float32)
    y = jax.block_until_ready(transformer_feed_forward(x, params, activation="relu"))
    y_ref = reference_ffn(x, params, activation="relu")
    assert y.shape == (B, T, C)
    assert jnp.allclose(y, y_ref, atol=2e-2, rtol=2e-2), "FFN mismatch (small / resident)"

    # --- case 2: gelu + forced hidden tiling (th_cap) -> exercises the f32 accumulator
    #     reduction path and ragged-M row padding.  grid (2, 3)
    B2, T2, C2, H2 = 2, 20, 128, 384
    params2 = init_params(k2, size=C2, hidden_size=H2)
    x2 = jax.random.normal(k3, (B2, T2, C2), jnp.float32)
    y2 = jax.block_until_ready(
        transformer_feed_forward(x2, params2, activation="gelu", th_cap=128)
    )
    y2_ref = reference_ffn(x2, params2, activation="gelu")
    assert y2.shape == (B2, T2, C2)
    assert jnp.allclose(y2, y2_ref, atol=2e-2, rtol=2e-2), "FFN mismatch (tiled / gelu)"

    # --- case 3: hidden size not a multiple of 128 with forced tiling -> exercises the
    #     zero-pad-H path (padded hidden units must contribute exactly 0).  grid (2, 2)
    B3, T3, C3, H3 = 2, 8, 64, 200
    params3 = init_params(k4, size=C3, hidden_size=H3)
    x3 = jax.random.normal(k5, (B3, T3, C3), jnp.float32)
    y3 = jax.block_until_ready(
        transformer_feed_forward(x3, params3, activation="relu", th_cap=128)
    )
    y3_ref = reference_ffn(x3, params3, activation="relu")
    assert y3.shape == (B3, T3, C3)
    assert jnp.allclose(y3, y3_ref, atol=2e-2, rtol=2e-2), "FFN mismatch (padded hidden)"

    print("KERNEL_OK")
</pallas_src>

<mosaic_0001>
module attributes {stable_mosaic.version = 11 : i64} {
  func.func @_ffn_kernel(%arg0: i32, %arg1: i32, %arg2: memref<16x32xbf16, #tpu.memory_space<vmem>>, %arg3: memref<32x64xbf16, #tpu.memory_space<vmem>>, %arg4: memref<1x64xf32, #tpu.memory_space<vmem>>, %arg5: memref<64x32xbf16, #tpu.memory_space<vmem>>, %arg6: memref<1x32xf32, #tpu.memory_space<vmem>>, %arg7: memref<16x32xf32, #tpu.memory_space<vmem>>, %arg8: memref<16x32xf32, #tpu.memory_space<vmem>>) attributes {dimension_semantics = [#tpu.dimension_semantics<parallel>, #tpu.dimension_semantics<arbitrary>], iteration_bounds = array<i64: 2, 1>, scalar_prefetch = 0 : i64, scratch_operands = 1 : i64, tpu.core_type = #tpu.core_type<tc>, window_params = [{transform_indices = @transform_0, window_bounds = array<i64: 16, 32>}, {transform_indices = @transform_1, window_bounds = array<i64: 32, 64>}, {transform_indices = @transform_2, window_bounds = array<i64: 1, 64>}, {transform_indices = @transform_3, window_bounds = array<i64: 64, 32>}, {pipeline_mode = #tpu.pipeline_mode<synchronous>, transform_indices = @transform_4, window_bounds = array<i64: 1, 32>}, {transform_indices = @transform_5, window_bounds = array<i64: 16, 32>}]} {
    %c0_i32 = arith.constant 0 : i32
    %0 = arith.cmpi eq, %arg1, %c0_i32 : i32
    %1 = arith.extui %0 : i1 to i32
    %c0_i32_0 = arith.constant 0 : i32
    %2 = arith.cmpi ne, %1, %c0_i32_0 : i32
    scf.if %2 {
      %cst_16 = arith.constant 0.000000e+00 : f32
      %20 = vector.broadcast %cst_16 : f32 to vector<16x32xf32>
      %c0_17 = arith.constant 0 : index
      %c0_18 = arith.constant 0 : index
      %21 = vector.load %arg8[%c0_17, %c0_18] : memref<16x32xf32, #tpu.memory_space<vmem>>, vector<16x32xf32>
      tpu.vector_store %arg8[%c0_17, %c0_18], %20 {strides = array<i32>} : memref<16x32xf32, #tpu.memory_space<vmem>>, vector<16x32xf32>,
    } else {
    }
    %c0 = arith.constant 0 : index
    %c0_1 = arith.constant 0 : index
    %3 = vector.load %arg2[%c0, %c0_1] : memref<16x32xbf16, #tpu.memory_space<vmem>>, vector<16x32xbf16>
    %c0_2 = arith.constant 0 : index
    %c0_3 = arith.constant 0 : index
    %4 = vector.load %arg3[%c0_2, %c0_3] : memref<32x64xbf16, #tpu.memory_space<vmem>>, vector<32x64xbf16>
    %cst = arith.constant dense<0.000000e+00> : vector<16x64xf32>
    %5 = tpu.matmul %3, %4, %cst {dimension_numbers = #tpu.dot_dimension_numbers<[1], [0], [0], [1], [0, 0, 1, 1], [], []>} : vector<16x32xbf16>, vector<32x64xbf16>, vector<16x64xf32> -> vector<16x64xf32>
    %c0_4 = arith.constant 0 : index
    %c0_5 = arith.constant 0 : index
    %6 = vector.load %arg4[%c0_4, %c0_5] : memref<1x64xf32, #tpu.memory_space<vmem>>, vector<1x64xf32>
    %7 = vector.broadcast %6 : vector<1x64xf32> to vector<16x64xf32>
    %8 = arith.addf %5, %7 : vector<16x64xf32>
    %cst_6 = arith.constant 0.000000e+00 : f32
    %9 = vector.broadcast %cst_6 : f32 to vector<16x64xf32>
    %10 = arith.maximumf %8, %9 : vector<16x64xf32>
    %c0_7 = arith.constant 0 : index
    %c0_8 = arith.constant 0 : index
    %11 = vector.load %arg8[%c0_7, %c0_8] : memref<16x32xf32, #tpu.memory_space<vmem>>, vector<16x32xf32>
    %12 = arith.truncf %10 : vector<16x64xf32> to vector<16x64xbf16>
    %c0_9 = arith.constant 0 : index
    %c0_10 = arith.constant 0 : index
    %13 = vector.load %arg5[%c0_9, %c0_10] : memref<64x32xbf16, #tpu.memory_space<vmem>>, vector<64x32xbf16>
    %cst_11 = arith.constant dense<0.000000e+00> : vector<16x32xf32>
    %14 = tpu.matmul %12, %13, %cst_11 {dimension_numbers = #tpu.dot_dimension_numbers<[1], [0], [0], [1], [0, 0, 1, 1], [], []>} : vector<16x64xbf16>, vector<64x32xbf16>, vector<16x32xf32> -> vector<16x32xf32>
    %15 = arith.addf %11, %14 : vector<16x32xf32>
    %c0_12 = arith.constant 0 : index
    %c0_13 = arith.constant 0 : index
    %16 = vector.load %arg8[%c0_12, %c0_13] : memref<16x32xf32, #tpu.memory_space<vmem>>, vector<16x32xf32>
    tpu.vector_store %arg8[%c0_12, %c0_13], %15 {strides = array<i32>} : memref<16x32xf32, #tpu.memory_space<vmem>>, vector<16x32xf32>,
    %c0_i32_14 = arith.constant 0 : i32
    %17 = arith.cmpi eq, %arg1, %c0_i32_14 : i32
    %18 = arith.extui %17 : i1 to i32
    %c0_i32_15 = arith.constant 0 : i32
    %19 = arith.cmpi ne, %18, %c0_i32_15 : i32
    scf.if %19 {
      %c0_16 = arith.constant 0 : index
      %c0_17 = arith.constant 0 : index
      %20 = vector.load %arg8[%c0_16, %c0_17] : memref<16x32xf32, #tpu.memory_space<vmem>>, vector<16x32xf32>
      %c0_18 = arith.constant 0 : index
      %c0_19 = arith.constant 0 : index
      %21 = vector.load %arg6[%c0_18, %c0_19] : memref<1x32xf32, #tpu.memory_space<vmem>>, vector<1x32xf32>
      %22 = vector.broadcast %21 : vector<1x32xf32> to vector<16x32xf32>
      %23 = arith.addf %20, %22 : vector<16x32xf32>
      %c0_20 = arith.constant 0 : index
      %c0_21 = arith.constant 0 : index
      %24 = vector.load %arg7[%c0_20, %c0_21] : memref<16x32xf32, #tpu.memory_space<vmem>>, vector<16x32xf32>
      tpu.vector_store %arg7[%c0_20, %c0_21], %23 {strides = array<i32>} : memref<16x32xf32, #tpu.memory_space<vmem>>, vector<16x32xf32>,
    } else {
    }
    return
  }
  func.func @transform_0(%arg0: i32, %arg1: i32) -> (i32, i32) {
    %c0_i32 = arith.constant 0 : i32
    %c0_i32_0 = arith.constant 0 : i32
    return %arg0, %c0_i32 : i32, i32
  }
  func.func @transform_1(%arg0: i32, %arg1: i32) -> (i32, i32) {
    %c0_i32 = arith.constant 0 : i32
    %c0_i32_0 = arith.constant 0 : i32
    return %c0_i32, %arg1 : i32, i32
  }
  func.func @transform_2(%arg0: i32, %arg1: i32) -> (i32, i32) {
    %c0_i32 = arith.constant 0 : i32
    %c0_i32_0 = arith.constant 0 : i32
    return %c0_i32, %arg1 : i32, i32
  }
  func.func @transform_3(%arg0: i32, %arg1: i32) -> (i32, i32) {
    %c0_i32 = arith.constant 0 : i32
    %c0_i32_0 = arith.constant 0 : i32
    return %arg1, %c0_i32 : i32, i32
  }
  func.func @transform_4(%arg0: i32, %arg1: i32) -> (i32, i32) {
    %c0_i32 = arith.constant 0 : i32
    %c0_i32_0 = arith.constant 0 : i32
    %c0_i32_1 = arith.constant 0 : i32
    return %c0_i32, %c0_i32_0 : i32, i32
  }
  func.func @transform_5(%arg0: i32, %arg1: i32) -> (i32, i32) {
    %c0_i32 = arith.constant 0 : i32
    %c0_i32_0 = arith.constant 0 : i32
    return %arg0, %c0_i32 : i32, i32
  }
}

</mosaic_0001>

<bundles_post_ra>
// kernel: tpu_custom_call.1
= control target key start
LH: loop header
LB: loop body
LE: loop exit
PB: predicated region body
PF: predicated region fallthrough
CT: control target
= control target key end

     0   :  { %10 = vsyncpa [#allocation4], 0  ;;  %s984_s0 = inlined_call_operand.vmem [shape: bf16[32,32], index: 0, kind: input, shape index: {}]   ;;  %s985_s1 = inlined_call_operand.vmem [shape: bf16[32,64], index: 1, kind: input, shape index: {}]   ;;  %s986_s2 = inlined_call_operand.vmem [shape: f32[1,64], index: 2, kind: input, shape index: {}]   ;;  %s987_s3 = inlined_call_operand.vmem [shape: bf16[64,32], index: 3, kind: input, shape index: {}]   ;;  %s988_s4 = inlined_call_operand.vmem [shape: f32[1,32], index: 4, kind: input, shape index: {}]   ;;  %s989_s5 = inlined_call_operand.hbm [shape: f32[32,32], index: 5, kind: output, shape index: {}]  }
   0x1   :  { %12 = vsyncpa [#allocation4 + $0x1], 0  ;;  %s839_s18 = smov 0   ;;  %s841_s19 = smov 0  }
   0x2   :  { %s843_s20 = smov 0   ;;  %s845_s21 = smov 0  }
   0x3   :  { %s847_s22 = smov 0   ;;  %s849_s23 = smov 0  }
   0x4 LB: > { %s602_s24 = sadd.s32 4294967295, %s802_s23   ;;  %s603_s25 = sadd.s32 4294967294, %s802_s23   ;;  %s802_s23 = sphi %s849_s23, %s18_s23   ;;  %s798_s22 = sphi %s847_s22, %s996_s22   ;;  %s794_s21 = sphi %s845_s21, %s995_s21   ;;  %s790_s20 = sphi %s843_s20, %s994_s20   ;;  %s786_s19 = sphi %s841_s19, %s993_s19   ;;  %s782_s18 = sphi %s839_s18, %s992_s18  }
   0x5   : > { %s30_s26 = sadd.s32 1, %s798_s22  ;;  %s162_s27 = sadd.s32 1, %s790_s20 }
   0x6   : > { %p32_p0 = scmp.ge.s32.totalorder %s30_s26, 2  ;;  %p172_p1 = scmp.ne.s32.totalorder %s790_s20, %s786_s19 }
   0x7   : > { %p173_p2 = scmp.eq.s32.totalorder %s602_s24, 1  ;;  %p178_p3 = scmp.ne.s32.totalorder %s786_s19, %s782_s18 }
   0x8   : > { %s998_s26 = smov (%p32_p0, %s30_s26), 0  ;;  %p179_p5 = scmp.eq.s32.totalorder %s603_s25, 1 }
   0x9   : > { %p879_p4 = por %p173_p2, %p172_p1  ;;  %s159_s29 = ssub.s32 %s798_s22, %s998_s26 }
   0xa   : > { %p609_p6 = scmp.ge.s32.totalorder %s802_s23, 1  ;;  %p160_p7 = scmp.eq.s32.totalorder %s159_s29, 0 }
   0xb   : > { %p886_p8 = por %p179_p5, %p178_p3  ;;  %p231_p9 = scmp.lt.s32.totalorder %s802_s23, 3 }
   0xc   : > { %s892_s6 = scalar_select %p160_p7, %s790_s20, %s162_s27  }
   0xd   : > { %p232_p10 = pnand %p609_p6, %p231_p9 }
   0xe   : > { %v717_v0 = vld [vmem:[%s985_s1] sm:$0xff] (!%p232_p10)   ;;  %v804_v1 = vmov (!%p232_p10), 0.0   ;;  %v718_v2 = vld [vmem:[%s985_s1 + $0x8] sm:$0xff] (!%p232_p10)   ;;  %vm805_vm0 = vmmov (!%p232_p10), 0   ;;  %s611_s11 = sshll.u32 (!%p232_p10), %s794_s21, 1  ;;  %vm296_vm1 = vcmask (!%p232_p10), 261120  }
   0xf   : > { %235 = sbr.rel (%p232_p10) target bundleno = 487 (0x1e7), region = 40  ;;  %638 = vmatprep.subr.bf16.mxu0 (!%p232_p10), %v804_v1  ;;  %646 = vmatprep.subr.bf16.mxu1 (!%p232_p10), %v804_v1  ;;  %p272_p11 = scmp.lt.s32.totalorder (!%p232_p10), %s611_s11, 3  ;;  %297 = vst.msk [vmem:[#allocation2] sm:$0xff] (!%p232_p10), %vm296_vm1, %v804_v1  ;;  %298 = vst.msk [vmem:[#allocation2 + $0x8] sm:$0xff] (!%p232_p10), %vm296_vm1, %v804_v1  ;;  %v720_v3 = vld [vmem:[%s987_s3] sm:$0xff] (!%p232_p10)   ;;  %v721_v4 = vld [vmem:[%s987_s3 + $0x8] sm:$0xff] (!%p232_p10)  }
  0x10   : > { %639 = vmatpush3.bf16.msra.mxu0 (!%p232_p10), %v717_v0  ;;  %642 = vmatprep.mubr.msk.bf16.mxu0 (!%p232_p10), %vm805_vm0, %v804_v1  ;;  %v722_v6 = vld [vmem:[%s987_s3 + $0x10] sm:$0xff] (!%p232_p10)   ;;  %v723_v7 = vld [vmem:[%s987_s3 + $0x18] sm:$0xff] (!%p232_p10)   ;;  %v613_v8 = vld [vmem:[%s986_s2] ss:$0 sm:$0xff] (!%p232_p10)  ;;  %vm411_vm2 = vcmask (!%p232_p10), 523264   ;;  %s629_s15 = sshll.u32 (!%p232_p10), %s794_s21, 8 }
  0x11   : > { %640 = vmatprep.subr.bf16.mxu0 (!%p232_p10), %v804_v1  ;;  %654 = vmatprep.mubr.msk.bf16.mxu1 (!%p232_p10), %vm805_vm0, %v804_v1  ;;  %v623_v26 = vld [vmem:[%s988_s4] ss:$0 sm:$0xff] (!%p232_p10)  ;;  %s932_s27 = scalar_lea.hbm (!%p232_p10), %s989_s5, %s629_s15  ;;  %s806_s7 = smov (!%p232_p10), [#allocation3]  }
  0x12   : > { %647 = vmatpush3.bf16.msra.mxu1 (!%p232_p10), %v720_v3  ;;  %s728_s8 = sshll.u32 (!%p232_p10), %s806_s7, 4  ;;  %s729_s8 = int_to_ptr.vmem [resolvable:$false] %s728_s8 }
  0x13   : > { %648 = vmatprep.subr.bf16.mxu1 (!%p232_p10), %v804_v1  ;;  %s730_s9 = scalar_lea.vmem (!%p232_p10), %s729_s8, 512 }
  0x14   : > { %641 = vmatpush3.bf16.msra.mxu0 (!%p232_p10), %v718_v2 }
  0x16   : > { %s1000_s11 = smov (!%p272_p11, %s611_s11), 3  ;;  %649 = vmatpush3.bf16.msra.mxu1 %v721_v4  ;;  %v376_v18 = vld [vmem:[#allocation2] sm:$0xff]  ;;  %v377_v20 = vld [vmem:[#allocation2 + $0x8] sm:$0xff] }
  0x17   : > { %s612_s16 = sshll.u32 %s1000_s11, 2  ;;  %650 = vmatprep.subr.bf16.mxu1 %v804_v1  ;;  %s268_s11 = sand.u32 1, %s786_s19  }
  0x18   : > { %s275_s25 = scalar_lea.vmem %s984_s0, %s612_s16  ;;  %s610_s12 = sshll.u32 %s268_s11, 4 }
  0x19   : > { %v719_v5 = vld [vmem:[%s275_s25] sm:$0xff]   ;;  %s270_s16 = scalar_lea.vmem [#allocation3], %s610_s12  ;;  %s938_s21 = scalar_lea.sflag [#allocation4], %s268_s11 }
  0x1a   : > { %643 = vmatmul.mubr.msk.bf16.vlgmr.msra.gmra.mrb[0].mxu0 %vm296_vm1, %v719_v5  ;;  %651 = vmatpush3.bf16.msra.mxu1 %v722_v6  ;;  %s490_s17 = sshll.u32 %s270_s16, 4  ;;  %s934_s17 = int_to_ptr.vmem [resolvable:$true] %s490_s17 }
  0x1b   : > { %652 = vmatprep.subr.bf16.mxu1 %v804_v1  ;;  %s724_s29 = scalar_lea.vmem %s934_s17, 256  ;;  %p731_p1 = scmp.lt.s32.totalorder %s934_s17, %s729_s8 }
  0x1c   : > { %p725_p12 = scmp.ne.s32.totalorder %s934_s17, %s724_s29  ;;  %p732_p2 = scmp.lt.s32.totalorder %s730_s9, %s724_s29 }
  0x1e   : > { %653 = vmatpush3.bf16.msra.mxu1 %v723_v7  ;;  %p726_p13 = pnand %p725_p12, %p879_p4  ;;  %p733_p3 = por %p732_p2, %p731_p1 }
  0x20   : > { %p727_p0 = pneg %p726_p13 }
  0x22   : > { %p734_p5 = pnand %p733_p3, %p727_p0 }
  0xed   : > { %v367_v9 = vpop.f32.mrb[0].mxu0 }
  0xee   : > { %v368_v10 = vadd.f32 %v613_v8, %v367_v9  ;;  %v644_v11 = vpop.f32.mrb[1].mxu0 }
  0xef   : > { %v370_v12 = vpop.f32.mrb[2].mxu0 }
  0xf0   : > { %v371_v13 = vadd.f32 %v613_v8, %v370_v12  ;;  %v645_v14 = vpop.f32.mrb[3].mxu0  ;;  %v374_v15 = vmax.f32 %v368_v10, 0.0 }
  0xf2   : > { %v375_v16 = vmax.f32 %v371_v13, 0.0 }
  0xf4   : > { %v378_v17 = vpack.c.bf16 %v375_v16, %v374_v15 }
  0xf6   : > { %655 = vmatmul.mubr.msk.bf16.vlgmr.msra.gmra.mrb[0].mxu1 %vm411_vm2, %v378_v17 }
 0x1c9   : > { %v449_v19 = vpop.f32.mrb[0].mxu1 }
 0x1ca   : > { %v456_v21 = vadd.f32 %v449_v19, %v376_v18  ;;  %v656_v22 = vpop.f32.mrb[1].mxu1 }
 0x1cb   : > { %v452_v23 = vpop.f32.mrb[2].mxu1 }
 0x1cc   : > { %458 = vst.msk [vmem:[#allocation2] sm:$0xff] %vm296_vm1, %v456_v21  ;;  %v457_v24 = vadd.f32 %v452_v23, %v377_v20  ;;  %v657_v25 = vpop.f32.mrb[3].mxu1 }
 0x1ce   : > { %459 = vst.msk [vmem:[#allocation2 + $0x8] sm:$0xff] %vm296_vm1, %v457_v24 }
 0x1d3   : > { %v463_v27 = vld [vmem:[#allocation2] sm:$0xff] }
 0x1d4   : > { %v472_v28 = vadd.f32 %v623_v26, %v463_v27 }
 0x1d5   : > { %v464_v29 = vld [vmem:[#allocation2 + $0x8] sm:$0xff] }
 0x1d6   : > { %v473_v30 = vadd.f32 %v623_v26, %v464_v29  ;;  %474 = vst.msk [vmem:[%s270_s16] sm:$0xff] %vm296_vm1, %v472_v28 }
 0x1d8   : > { %475 = vst.msk [vmem:[%s270_s16 + $0x8] sm:$0xff] %vm296_vm1, %v473_v30 }
 0x1d9   : > { %737 = shalt.err (!%p734_p5)
}
 0x1da   : > { %s738_s10 = scalar_lea.hbm %s932_s27, 256  ;;  %s742_s13 = scalar_lea.hbm %s989_s5, 512 }
 0x1db   : > { %p739_p6 = scmp.ne.s32.totalorder %s932_s27, %s738_s10  ;;  %p743_p10 = scmp.lt.u32.totalorder %s932_s27, %s989_s5 }
 0x1dc   : > { %p744_p11 = scmp.lt.u32.totalorder %s742_s13, %s738_s10  ;;  %p746_p13 = scmp.lt.u32.totalorder %s738_s10, %s932_s27 }
 0x1dd   : > { %p740_p7 = pnand %p739_p6, %p879_p4 }
 0x1de   : > { %p745_p12 = por %p744_p11, %p743_p10 }
 0x1df   : > { %p741_p9 = pneg %p740_p7 }
 0x1e0   : > { %p747_p0 = por %p746_p13, %p745_p12 }
 0x1e2   : > { %p748_p1 = pnand %p747_p0, %p741_p9 }
 0x1e4   : > { %751 = shalt.err (!%p748_p1)
}
 0x1e5   : > { %s807_s16 = smov 128   ;;  %s808_s24 = smov 8  }
 0x1e6   : > { %658 = dma.vmem_to_hbm [thread:$0]  (%p879_p4), %s934_s17, 256, %s932_s27, %s938_s21, %s807_s16, %s807_s16, %s808_s24  }
 0x1e7 PF: > { %p664_p2 = scmp.ge.s32.totalorder %s802_s23, 2  ;;  %s505_s25 = sand.u32 1, %s782_s18  }
 0x1e8   : > { %s506_s29 = scalar_lea.sflag [#allocation4], %s505_s25 }
 0x1e9   : > { %p661_p3 = pnand %p664_p2, %p886_p8 }
 0x1eb   : > { %777 = dma.done.wait (!%p661_p3), %s506_s29, 256  }
 0x1ec   : > { %779 = vsyncadd (!%p661_p3), %s506_s29, 4294967040  ;;  %s18_s23 = sadd.s32 1, %s802_s23   ;;  %s992_s18 = smov %s786_s19 }
 0x1ed   : > { %p15_p5 = scmp.ge.s32.totalorder %s18_s23, 4   ;;  %s993_s19 = smov %s790_s20 }
 0x1ee   : > { %s994_s20 = smov %s892_s6  ;;  %s995_s21 = smov %s798_s22 }
 0x1ef   : > { %s996_s22 = smov %s998_s26  ;;  %17 = sbr.rel (!%p15_p5) target bundleno = 4 (0x4), region = 92 }
 0x1f6   :  { %511 = vsyncpa [#allocation4], 1 }
 0x1f7   :  { %513 = vsyncpa [#allocation4 + $0x1], 1 }

</bundles_post_ra>
